<compile_context>
chip_gen: v7x
topology: tpu7x:2x2x1
jax: 0.10.0
libtpu: 0.0.40
codegen_flags: <defaults>
</compile_context>

<pallas_src>
import functools

import jax
import jax.numpy as jnp
from jax.experimental import pallas as pl
from jax.experimental.pallas import tpu as pltpu

_IN_FEATURES = 256
_OUT_FEATURES = 10
_MAX_TILE_B = 8192  # 8192 * 256 * 4 B = 8 MiB per x tile -> 16 MiB double-buffered.


def _round_up(x, m):
    return (x + m - 1) // m * m


def _linear_kernel(x_ref, w_ref, b_ref, o_ref):
    # x_ref: [TILE_B, 256] f32
    # w_ref: [10, 256]     f32 (PyTorch nn.Linear layout; contracted on dim 1)
    # b_ref: [1, 10]       f32
    # o_ref: [TILE_B, 10]  f32
    acc = jax.lax.dot_general(
        x_ref[...], w_ref[...],
        dimension_numbers=(((1,), (1,)), ((), ())),
        preferred_element_type=jnp.float32)
    o_ref[...] = (acc + b_ref[...]).astype(o_ref.dtype)


@functools.partial(jax.jit, static_argnames=("max_tile_b",))
def classifier_cnn_small(x, weight, bias, *, max_tile_b=_MAX_TILE_B):
    """Forward pass of ClassifierCNNSmall.

    Args:
      x:      [B, C, H, W] float32 with C*H*W == 256 (NCHW, matches PyTorch)
      weight: [10, 256] float32 (PyTorch nn.Linear weight layout)
      bias:   [10] float32
    Returns:
      [B, 10] float32
    """
    b = x.shape[0]
    x_flat = x.reshape(b, -1)  # Flatten(start_dim=1); row-major like PyTorch.
    assert x_flat.shape[1] == _IN_FEATURES
    assert weight.shape == (_OUT_FEATURES, _IN_FEATURES)

    # Batch tile: multiple of 8 (f32 sublane quantum), capped at max_tile_b.
    tile_b = min(max_tile_b, _round_up(b, 8))
    b_pad = _round_up(b, tile_b)
    if b_pad != b:
        x_flat = jnp.pad(x_flat, ((0, b_pad - b), (0, 0)))
    num_tiles = b_pad // tile_b

    bias2d = bias.reshape(1, _OUT_FEATURES)  # metadata-only reshape

    # Deeper input buffering only when the grid is long enough to benefit.
    if num_tiles >= 3:
        x_spec = pl.BlockSpec((tile_b, _IN_FEATURES), lambda i: (i, 0),
                              pipeline_mode=pl.Buffered(3))
    else:
        x_spec = pl.BlockSpec((tile_b, _IN_FEATURES), lambda i: (i, 0))

    out = pl.pallas_call(
        _linear_kernel,
        out_shape=jax.ShapeDtypeStruct((b_pad, _OUT_FEATURES), jnp.float32),
        grid=(num_tiles,),
        in_specs=[
            x_spec,
            # Constant index_maps: weight/bias stay VMEM-resident across steps.
            pl.BlockSpec((_OUT_FEATURES, _IN_FEATURES), lambda i: (0, 0)),
            pl.BlockSpec((1, _OUT_FEATURES), lambda i: (0, 0)),
        ],
        out_specs=pl.BlockSpec((tile_b, _OUT_FEATURES), lambda i: (i, 0)),
        compiler_params=pltpu.CompilerParams(
            dimension_semantics=("parallel",),
            vmem_limit_bytes=32 * 1024 * 1024,
        ),
    )(x_flat, weight, bias2d)

    return out[:b]


def init_params(key):
    """Deterministic init mimicking nn.Linear(256, 10) default init."""
    k_w, k_b = jax.random.split(key)
    bound = 1.0 / jnp.sqrt(float(_IN_FEATURES))
    weight = jax.random.uniform(k_w, (_OUT_FEATURES, _IN_FEATURES),
                                jnp.float32, -bound, bound)
    bias = jax.random.uniform(k_b, (_OUT_FEATURES,), jnp.float32, -bound, bound)
    return weight, bias


if __name__ == "__main__":
    key = jax.random.PRNGKey(0)
    k_x, k_p = jax.random.split(key)

    # Small NCHW input whose flattened feature size is 4*8*8 = 256.
    x = jax.random.normal(k_x, (2, 4, 8, 8), jnp.float32)
    weight, bias = init_params(k_p)

    out = jax.block_until_ready(classifier_cnn_small(x, weight, bias))

    # Reference check in plain JAX.
    ref = x.reshape(2, -1) @ weight.T + bias
    assert out.shape == (2, 10)
    assert jnp.allclose(out, ref, atol=1e-5, rtol=1e-5)

    print("KERNEL_OK")
</pallas_src>

<mosaic_0001>
module attributes {stable_mosaic.version = 11 : i64} {
  func.func @_linear_kernel(%arg0: i32, %arg1: memref<8x256xf32, #tpu.memory_space<vmem>>, %arg2: memref<10x256xf32, #tpu.memory_space<vmem>>, %arg3: memref<1x10xf32, #tpu.memory_space<vmem>>, %arg4: memref<8x10xf32, #tpu.memory_space<vmem>>) attributes {dimension_semantics = [#tpu.dimension_semantics<parallel>], iteration_bounds = array<i64: 1>, scalar_prefetch = 0 : i64, scratch_operands = 0 : i64, tpu.core_type = #tpu.core_type<tc>, window_params = [{transform_indices = @transform_0, window_bounds = array<i64: 8, 256>}, {pipeline_mode = #tpu.pipeline_mode<synchronous>, transform_indices = @transform_1, window_bounds = array<i64: 10, 256>}, {pipeline_mode = #tpu.pipeline_mode<synchronous>, transform_indices = @transform_2, window_bounds = array<i64: 1, 10>}, {transform_indices = @transform_3, window_bounds = array<i64: 8, 10>}]} {
    %c0 = arith.constant 0 : index
    %c0_0 = arith.constant 0 : index
    %0 = vector.load %arg1[%c0, %c0_0] : memref<8x256xf32, #tpu.memory_space<vmem>>, vector<8x256xf32>
    %c0_1 = arith.constant 0 : index
    %c0_2 = arith.constant 0 : index
    %1 = vector.load %arg2[%c0_1, %c0_2] : memref<10x256xf32, #tpu.memory_space<vmem>>, vector<10x256xf32>
    %cst = arith.constant dense<0.000000e+00> : vector<8x10xf32>
    %2 = tpu.matmul %0, %1, %cst {dimension_numbers = #tpu.dot_dimension_numbers<[1], [1], [0], [0], [0, 0, 1, 0], [], []>} : vector<8x256xf32>, vector<10x256xf32>, vector<8x10xf32> -> vector<8x10xf32>
    %c0_3 = arith.constant 0 : index
    %c0_4 = arith.constant 0 : index
    %3 = vector.load %arg3[%c0_3, %c0_4] : memref<1x10xf32, #tpu.memory_space<vmem>>, vector<1x10xf32>
    %4 = vector.broadcast %3 : vector<1x10xf32> to vector<8x10xf32>
    %5 = arith.addf %2, %4 : vector<8x10xf32>
    %c0_5 = arith.constant 0 : index
    %c0_6 = arith.constant 0 : index
    %6 = vector.load %arg4[%c0_5, %c0_6] : memref<8x10xf32, #tpu.memory_space<vmem>>, vector<8x10xf32>
    tpu.vector_store %arg4[%c0_5, %c0_6], %5 {strides = array<i32>} : memref<8x10xf32, #tpu.memory_space<vmem>>, vector<8x10xf32>,
    return
  }
  func.func @transform_0(%arg0: i32) -> (i32, i32) {
    %c0_i32 = arith.constant 0 : i32
    %c0_i32_0 = arith.constant 0 : i32
    return %arg0, %c0_i32 : i32, i32
  }
  func.func @transform_1(%arg0: i32) -> (i32, i32) {
    %c0_i32 = arith.constant 0 : i32
    %c0_i32_0 = arith.constant 0 : i32
    %c0_i32_1 = arith.constant 0 : i32
    return %c0_i32, %c0_i32_0 : i32, i32
  }
  func.func @transform_2(%arg0: i32) -> (i32, i32) {
    %c0_i32 = arith.constant 0 : i32
    %c0_i32_0 = arith.constant 0 : i32
    %c0_i32_1 = arith.constant 0 : i32
    return %c0_i32, %c0_i32_0 : i32, i32
  }
  func.func @transform_3(%arg0: i32) -> (i32, i32) {
    %c0_i32 = arith.constant 0 : i32
    %c0_i32_0 = arith.constant 0 : i32
    return %arg0, %c0_i32 : i32, i32
  }
}

</mosaic_0001>

<bundles_post_ra>
// kernel: classifier_cnn_small.1
= control target key start
LH: loop header
LB: loop body
LE: loop exit
PB: predicated region body
PF: predicated region fallthrough
CT: control target
= control target key end

     0   :  { %vm97_vm0 = vcmask 80896   ;;  %s152_s1 = inlined_call_operand.vmem [shape: f32[10,256], index: 1, kind: input, shape index: {}]   ;;  %s153_s0 = inlined_call_operand.vmem [shape: f32[8,256], index: 0, kind: input, shape index: {}]   ;;  %s154_s2 = inlined_call_operand.vmem [shape: f32[1,10], index: 2, kind: input, shape index: {}]   ;;  %s155_s3 = inlined_call_operand.vmem [shape: f32[8,10], index: 3, kind: output, shape index: {}]  }
   0x1   :  { %v17_v0 = vld [vmem:[%s152_s1 + $0x8] sm:$0xff]  ;;  %v19_v1 = vld [vmem:[%s152_s1 + $0x18] sm:$0x3]  ;;  %v16_v2 = vld [vmem:[%s152_s1] sm:$0xff] }
   0x2   :  { %v104_v3 = vpack.c.bf16 %v19_v1, %v17_v0  ;;  %v18_v4 = vld [vmem:[%s152_s1 + $0x10] sm:$0x3]  ;;  %v15_v5 = vld [vmem:[%s153_s0 + $0x8] sm:$0xff]  ;;  %v14_v7 = vld [vmem:[%s153_s0] sm:$0xff] }
   0x3   :  { %v106_v6 = vpack.c.bf16 %v18_v4, %v16_v2  ;;  %91 = vmatprep.mubr.f32.mxu0 %v15_v5  ;;  %v103_v8 = vld [vmem:[%s154_s2] ss:$0 sm:$0xff] }
   0x4   :  { %105 = vmatprep.subr.bf16.mxu0 %v104_v3 }
   0x5   :  { %107 = vmatpush1.bf16.xpose.msra.mxu0 %v106_v6 }
   0xc   :  { %92 = vmatmul.mubr.f32.vlgmr.msra.gmra.mrb[0].mxu0 %v14_v7 }
  0xdf   :  { %v93_v9 = vpop.f32.mrb[0].mxu0 }
  0xe0   :  { %v94_v10 = vadd.f32 %v103_v8, %v93_v9  ;;  %v95_v11 = vpop.f32.mrb[1].mxu0 }
  0xe2   :  { %98 = vst.msk [vmem:[%s155_s3] sm:$0xff] %vm97_vm0, %v94_v10 }

</bundles_post_ra>
